<compile_context>
chip_gen: v6e
topology: v6e:2x2x1
jax: 0.10.0
libtpu: 0.0.40
codegen_flags: <defaults>
</compile_context>

<pallas_src>
import random

import jax
import jax.numpy as jnp
from jax.experimental import pallas as pl
from jax.experimental.pallas import tpu as pltpu

# ----- small, module-consistent shapes -----
X_DIM = 4      # config.x_dim
H_DIM = 32     # config.h_dim
SEQ = 8        # config.rolling_size (sequence_length)
BATCH = 4
BATCH_PAD = 8  # pad batch to the 8-sublane granularity

# ----- replicate __init__ randomness (Encoder first, then Decoder) -----
# TODO(synk): the reference does NOT seed the global RNG; seed(0) here only
# makes the baked skip/mask constants reproducible (an arbitrary torch
# instance will generally draw different skip sizes / masks).
random.seed(0)


def _init_skip_and_masks(seq_len):
    skip = random.randint(1, 10)
    masks = []
    for _ in range(seq_len):
        w1 = random.randint(0, 1)
        w2 = 1 if w1 == 0 else random.randint(0, 1)
        masks.append((w1, w2))
    return skip, masks


ENC_SKIP, ENC_MASKS = _init_skip_and_masks(SEQ)   # Encoder.__init__
DEC_SKIP, DEC_MASKS = _init_skip_and_masks(SEQ)   # Decoder.__init__


# ----- Pallas kernel: full RAE forward (single gridless invocation) -----
def rae_kernel(x_ref,                                           # (T*Bp, X) time-major, batch-padded
               we_ih_ref, we_hh_ref, be_ih_ref, be_hh_ref,      # encoder GRUCell, packed (gates r|z|n)
               wd_ih_ref, wd_hh_ref, bd_ih_ref, bd_hh_ref,      # decoder GRUCell, packed
               wlin_ref, blin_ref,                              # decoder Linear
               out_ref):                                        # (T*Bp, X) time-major
    f32 = jnp.float32
    Bp, T, H, X = BATCH_PAD, SEQ, H_DIM, X_DIM

    # ----- hoisted loads / loop-invariant precompute (off the serial path) -----
    we_hh = we_hh_ref[...]
    wd_hh = wd_hh_ref[...]
    wd_ih = wd_ih_ref[...]
    wlin = wlin_ref[...]
    blin = blin_ref[...]
    be_hh_b = jnp.broadcast_to(be_hh_ref[...], (Bp, 3 * H))
    bd_hh_b = jnp.broadcast_to(bd_hh_ref[...], (Bp, 3 * H))
    bd_ih_b = jnp.broadcast_to(bd_ih_ref[...], (Bp, 3 * H))
    # Fold the decoder Linear into the next step's input projection:
    #   xg_i = proj_{i-1} @ wd_ih + bd_ih
    #        = (lin_in_{i-1} @ wlin + blin) @ wd_ih + bd_ih
    #        = lin_in_{i-1} @ W_fused + b_fused
    w_fused = jnp.dot(wlin, wd_ih, preferred_element_type=f32)            # (H, 3H)
    b_fused_b = jnp.broadcast_to(
        jnp.dot(blin, wd_ih, preferred_element_type=f32) + bd_ih_ref[...],
        (Bp, 3 * H))

    def gru_step(x_gates, h_prev, whh, bhh_b):
        """x_gates: (Bp, 3H) already includes b_ih.  h_prev None means exact zeros."""
        if h_prev is None:
            h_gates = bhh_b
        else:
            h_gates = jnp.dot(h_prev, whh, preferred_element_type=f32) + bhh_b
        # Single EUP sigmoid over the packed r|z lanes (one push instead of two).
        rz = jax.nn.sigmoid(x_gates[:, :2 * H] + h_gates[:, :2 * H])
        r = rz[:, :H]
        z = rz[:, H:]
        n = jnp.tanh(x_gates[:, 2 * H:] + r * h_gates[:, 2 * H:])
        if h_prev is None:
            return (1.0 - z) * n              # z * 0 dropped
        return (1.0 - z) * n + z * h_prev

    def mix(a, w1, b, w2):
        """Constant-folded `a*w1 + b*w2` with None == exact zeros."""
        terms = []
        if w1 and a is not None:
            terms.append(a)
        if w2 and b is not None:
            terms.append(b)
        if not terms:
            return None
        if len(terms) == 1:
            return terms[0]
        return terms[0] + terms[1]

    def addm(a, b):
        if a is None:
            return b
        if b is None:
            return a
        return a + b

    # ---------------- Encoder ----------------
    # Hoisted input projection: all T timesteps in one matmul (no loop-carried dep).
    enc_xg_all = jnp.dot(x_ref[...], we_ih_ref[...],
                         preferred_element_type=f32) + be_ih_ref[...]   # (T*Bp, 3H)

    # h_i_original and h_i_skip are identical chunks of repeat(1,2) -> both = GRU output.
    enc_origs = [None]                       # initial zeros hidden
    enc_skips = [None] * ENC_SKIP            # skip_size zero hiddens
    for i in range(T):
        w1, w2 = ENC_MASKS[i]
        # Python negative-list indexing reproduces h_i_skips[i - skip_size] exactly.
        h_prev = mix(enc_origs[i], w1, enc_skips[i - ENC_SKIP], w2)
        xg = enc_xg_all[i * Bp:(i + 1) * Bp, :]
        h = gru_step(xg, h_prev, we_hh, be_hh_b)
        enc_origs.append(h)
        enc_skips.append(h)
    h_enc = enc_origs[-1] + enc_skips[-1]    # = 2 * last GRU output (repeat/chunk semantics)

    # ---------------- Decoder ----------------
    dec_origs = [h_enc]
    dec_skips = [None] * DEC_SKIP
    lin_ins = []                              # inputs to the (hoisted) Linear
    for i in range(T):
        if i == 0:
            # GO = zeros -> x @ W_ih == 0, so x-gates are just bd_ih (NOT b_fused).
            xg = bd_ih_b
        else:
            xg = jnp.dot(lin_ins[i - 1], w_fused,
                         preferred_element_type=f32) + b_fused_b
        w1, w2 = DEC_MASKS[i]
        h_prev = mix(dec_origs[i], w1, dec_skips[i - DEC_SKIP], w2)
        h = gru_step(xg, h_prev, wd_hh, bd_hh_b)
        dec_origs.append(h)
        dec_skips.append(h)
        # In the reference, the linear's skip index is resolved AFTER the append
        # (list is one longer) — Python list negative indexing matches that here.
        lin_ins.append(addm(dec_origs[i], dec_skips[i - DEC_SKIP]))

    # One batched projection, off the critical path; single contiguous time-major store.
    lin_all = jnp.concatenate(lin_ins, axis=0)                         # (T*Bp, H)
    out_ref[...] = jnp.dot(lin_all, wlin, preferred_element_type=f32) + blin


# ----- wrapper (jitted so pad/transpose/reshape fuse with the pallas_call) -----
@jax.jit
def rae_forward(x, params):
    B, T, Xd = x.shape
    Bp = BATCH_PAD
    xp = jnp.pad(x, ((0, Bp - B), (0, 0), (0, 0)))
    x_tm = jnp.transpose(xp, (1, 0, 2)).reshape(T * Bp, Xd)   # time-major, flat rows

    n_in = 1 + len(params)
    out_tm = pl.pallas_call(
        rae_kernel,
        out_shape=jax.ShapeDtypeStruct((T * Bp, Xd), jnp.float32),
        in_specs=[pl.BlockSpec(memory_space=pltpu.MemorySpace.VMEM)
                  for _ in range(n_in)],
        out_specs=pl.BlockSpec(memory_space=pltpu.MemorySpace.VMEM),
        cost_estimate=pl.CostEstimate(flops=1_400_000,
                                      transcendentals=12_288,
                                      bytes_accessed=72_000),
    )(x_tm, *params)
    # (T*Bp, X) -> (T, Bp, X) -> (Bp, T, X) -> unpad
    return jnp.transpose(out_tm.reshape(T, Bp, Xd), (1, 0, 2))[:B]


def init_params(key):
    """Packed-gate layout: W_ih:(in,3H), W_hh:(H,3H), biases (1,3H); columns r|z|n."""
    bound = 1.0 / (H_DIM ** 0.5)   # PyTorch GRUCell/Linear default uniform bound

    def u(k, shape):
        return jax.random.uniform(k, shape, jnp.float32, -bound, bound)

    ks = jax.random.split(key, 11)
    we_ih = u(ks[0], (X_DIM, 3 * H_DIM))
    we_hh = u(ks[1], (H_DIM, 3 * H_DIM))
    be_ih = u(ks[2], (1, 3 * H_DIM))
    be_hh = u(ks[3], (1, 3 * H_DIM))
    wd_ih = u(ks[4], (X_DIM, 3 * H_DIM))
    wd_hh = u(ks[5], (H_DIM, 3 * H_DIM))
    bd_ih = u(ks[6], (1, 3 * H_DIM))
    bd_hh = u(ks[7], (1, 3 * H_DIM))
    wlin = u(ks[8], (H_DIM, X_DIM))
    blin = u(ks[9], (1, X_DIM))
    return (we_ih, we_hh, be_ih, be_hh,
            wd_ih, wd_hh, bd_ih, bd_hh, wlin, blin), ks[10]


# ----- pure-JAX reference (literal, unfused, mirrors the PyTorch module) -----
def rae_reference(x, params):
    (we_ih, we_hh, be_ih, be_hh, wd_ih, wd_hh, bd_ih, bd_hh, wlin, blin) = params
    B, T, Xd = x.shape
    H = H_DIM

    def split3(w):
        return w[:, :H], w[:, H:2 * H], w[:, 2 * H:]

    def gru(x_t, h, wih, whh, bih, bhh):
        wir, wiz, win = split3(wih)
        whr, whz, whn = split3(whh)
        bir, biz, bin_ = split3(bih)
        bhr, bhz, bhn = split3(bhh)
        r = jax.nn.sigmoid(x_t @ wir + bir + h @ whr + bhr)
        z = jax.nn.sigmoid(x_t @ wiz + biz + h @ whz + bhz)
        n = jnp.tanh(x_t @ win + bin_ + r * (h @ whn + bhn))
        return (1.0 - z) * n + z * h

    zeros_h = jnp.zeros((B, H), jnp.float32)
    origs, skips = [zeros_h], [zeros_h] * ENC_SKIP
    for i in range(T):
        w1, w2 = ENC_MASKS[i]
        h = gru(x[:, i, :], origs[i] * w1 + skips[i - ENC_SKIP] * w2,
                we_ih, we_hh, be_ih, be_hh)
        origs.append(h)
        skips.append(h)
    h_enc = origs[-1] + skips[-1]

    GO = jnp.zeros((B, Xd), jnp.float32)
    origs, skips, outs = [h_enc], [zeros_h] * DEC_SKIP, []
    for i in range(T):
        gin = GO if i == 0 else outs[i - 1]
        w1, w2 = DEC_MASKS[i]
        h = gru(gin, origs[i] * w1 + skips[i - DEC_SKIP] * w2,
                wd_ih, wd_hh, bd_ih, bd_hh)
        origs.append(h)
        skips.append(h)
        outs.append((origs[i] + skips[i - DEC_SKIP]) @ wlin + blin)
    return jnp.stack(outs, axis=1)


if __name__ == "__main__":
    key = jax.random.PRNGKey(0)
    params, xkey = init_params(key)
    x = jax.random.normal(xkey, (BATCH, SEQ, X_DIM), jnp.float32)

    out = rae_forward(x, params)
    out = jax.block_until_ready(out)
    assert out.shape == (BATCH, SEQ, X_DIM)
    assert bool(jnp.all(jnp.isfinite(out)))

    ref = jax.block_until_ready(rae_reference(x, params))
    assert bool(jnp.allclose(out, ref, atol=2e-3, rtol=2e-3)), \
        "Pallas kernel diverges from pure-JAX reference"

    print("KERNEL_OK")
</pallas_src>

<mosaic_0001>
module attributes {stable_mosaic.version = 11 : i64} {
  func.func @rae_kernel(%arg0: memref<64x4xf32, #tpu.memory_space<vmem>>, %arg1: memref<4x96xf32, #tpu.memory_space<vmem>>, %arg2: memref<32x96xf32, #tpu.memory_space<vmem>>, %arg3: memref<1x96xf32, #tpu.memory_space<vmem>>, %arg4: memref<1x96xf32, #tpu.memory_space<vmem>>, %arg5: memref<4x96xf32, #tpu.memory_space<vmem>>, %arg6: memref<32x96xf32, #tpu.memory_space<vmem>>, %arg7: memref<1x96xf32, #tpu.memory_space<vmem>>, %arg8: memref<1x96xf32, #tpu.memory_space<vmem>>, %arg9: memref<32x4xf32, #tpu.memory_space<vmem>>, %arg10: memref<1x4xf32, #tpu.memory_space<vmem>>, %arg11: memref<64x4xf32, #tpu.memory_space<vmem>>) attributes {dimension_semantics = [], scalar_prefetch = 0 : i64, scratch_operands = 0 : i64, tpu.core_type = #tpu.core_type<tc>} {
    %c0 = arith.constant 0 : index
    %c0_0 = arith.constant 0 : index
    %0 = vector.load %arg6[%c0, %c0_0] : memref<32x96xf32, #tpu.memory_space<vmem>>, vector<32x96xf32>
    %c0_1 = arith.constant 0 : index
    %c0_2 = arith.constant 0 : index
    %1 = vector.load %arg5[%c0_1, %c0_2] : memref<4x96xf32, #tpu.memory_space<vmem>>, vector<4x96xf32>
    %c0_3 = arith.constant 0 : index
    %c0_4 = arith.constant 0 : index
    %2 = vector.load %arg9[%c0_3, %c0_4] : memref<32x4xf32, #tpu.memory_space<vmem>>, vector<32x4xf32>
    %c0_5 = arith.constant 0 : index
    %c0_6 = arith.constant 0 : index
    %3 = vector.load %arg10[%c0_5, %c0_6] : memref<1x4xf32, #tpu.memory_space<vmem>>, vector<1x4xf32>
    %c0_7 = arith.constant 0 : index
    %c0_8 = arith.constant 0 : index
    %4 = vector.load %arg4[%c0_7, %c0_8] : memref<1x96xf32, #tpu.memory_space<vmem>>, vector<1x96xf32>
    %5 = vector.shape_cast %4 : vector<1x96xf32> to vector<1x96xf32>
    %6 = vector.broadcast %5 : vector<1x96xf32> to vector<8x96xf32>
    %c0_9 = arith.constant 0 : index
    %c0_10 = arith.constant 0 : index
    %7 = vector.load %arg8[%c0_9, %c0_10] : memref<1x96xf32, #tpu.memory_space<vmem>>, vector<1x96xf32>
    %8 = vector.shape_cast %7 : vector<1x96xf32> to vector<1x96xf32>
    %9 = vector.broadcast %8 : vector<1x96xf32> to vector<8x96xf32>
    %c0_11 = arith.constant 0 : index
    %c0_12 = arith.constant 0 : index
    %10 = vector.load %arg7[%c0_11, %c0_12] : memref<1x96xf32, #tpu.memory_space<vmem>>, vector<1x96xf32>
    %11 = vector.shape_cast %10 : vector<1x96xf32> to vector<1x96xf32>
    %12 = vector.broadcast %11 : vector<1x96xf32> to vector<8x96xf32>
    %cst = arith.constant dense<0.000000e+00> : vector<32x96xf32>
    %13 = tpu.matmul %2, %1, %cst {dimension_numbers = #tpu.dot_dimension_numbers<[1], [0], [0], [1], [0, 0, 1, 1], [], []>} : vector<32x4xf32>, vector<4x96xf32>, vector<32x96xf32> -> vector<32x96xf32>
    %cst_13 = arith.constant dense<0.000000e+00> : vector<1x96xf32>
    %14 = tpu.matmul %3, %1, %cst_13 {dimension_numbers = #tpu.dot_dimension_numbers<[1], [0], [0], [1], [0, 0, 1, 1], [], []>} : vector<1x4xf32>, vector<4x96xf32>, vector<1x96xf32> -> vector<1x96xf32>
    %c0_14 = arith.constant 0 : index
    %c0_15 = arith.constant 0 : index
    %15 = vector.load %arg7[%c0_14, %c0_15] : memref<1x96xf32, #tpu.memory_space<vmem>>, vector<1x96xf32>
    %16 = arith.addf %14, %15 : vector<1x96xf32>
    %17 = vector.shape_cast %16 : vector<1x96xf32> to vector<1x96xf32>
    %18 = vector.broadcast %17 : vector<1x96xf32> to vector<8x96xf32>
    %c0_16 = arith.constant 0 : index
    %c0_17 = arith.constant 0 : index
    %19 = vector.load %arg0[%c0_16, %c0_17] : memref<64x4xf32, #tpu.memory_space<vmem>>, vector<64x4xf32>
    %c0_18 = arith.constant 0 : index
    %c0_19 = arith.constant 0 : index
    %20 = vector.load %arg1[%c0_18, %c0_19] : memref<4x96xf32, #tpu.memory_space<vmem>>, vector<4x96xf32>
    %cst_20 = arith.constant dense<0.000000e+00> : vector<64x96xf32>
    %21 = tpu.matmul %19, %20, %cst_20 {dimension_numbers = #tpu.dot_dimension_numbers<[1], [0], [0], [1], [0, 0, 1, 1], [], []>} : vector<64x4xf32>, vector<4x96xf32>, vector<64x96xf32> -> vector<64x96xf32>
    %c0_21 = arith.constant 0 : index
    %c0_22 = arith.constant 0 : index
    %22 = vector.load %arg3[%c0_21, %c0_22] : memref<1x96xf32, #tpu.memory_space<vmem>>, vector<1x96xf32>
    %23 = vector.broadcast %22 : vector<1x96xf32> to vector<64x96xf32>
    %24 = arith.addf %21, %23 : vector<64x96xf32>
    %25 = vector.extract_strided_slice %24 {offsets = [56, 0], sizes = [8, 96], strides = [1, 1]} : vector<64x96xf32> to vector<8x96xf32>
    %26 = vector.extract_strided_slice %25 {offsets = [0, 0], sizes = [8, 64], strides = [1, 1]} : vector<8x96xf32> to vector<8x64xf32>
    %27 = vector.extract_strided_slice %6 {offsets = [0, 0], sizes = [8, 64], strides = [1, 1]} : vector<8x96xf32> to vector<8x64xf32>
    %28 = arith.addf %26, %27 : vector<8x64xf32>
    %29 = arith.negf %28 : vector<8x64xf32>
    %30 = math.exp %29 : vector<8x64xf32>
    %cst_23 = arith.constant 1.000000e+00 : f32
    %31 = vector.broadcast %cst_23 : f32 to vector<8x64xf32>
    %32 = arith.addf %31, %30 : vector<8x64xf32>
    %33 = arith.divf %31, %32 : vector<8x64xf32>
    %34 = vector.extract_strided_slice %33 {offsets = [0, 0], sizes = [8, 32], strides = [1, 1]} : vector<8x64xf32> to vector<8x32xf32>
    %35 = vector.extract_strided_slice %33 {offsets = [0, 32], sizes = [8, 32], strides = [1, 1]} : vector<8x64xf32> to vector<8x32xf32>
    %36 = vector.extract_strided_slice %25 {offsets = [0, 64], sizes = [8, 32], strides = [1, 1]} : vector<8x96xf32> to vector<8x32xf32>
    %37 = vector.extract_strided_slice %6 {offsets = [0, 64], sizes = [8, 32], strides = [1, 1]} : vector<8x96xf32> to vector<8x32xf32>
    %38 = arith.mulf %34, %37 : vector<8x32xf32>
    %39 = arith.addf %36, %38 : vector<8x32xf32>
    %40 = math.tanh %39 : vector<8x32xf32>
    %cst_24 = arith.constant 1.000000e+00 : f32
    %41 = vector.broadcast %cst_24 : f32 to vector<8x32xf32>
    %42 = arith.subf %41, %35 : vector<8x32xf32>
    %43 = arith.mulf %42, %40 : vector<8x32xf32>
    %44 = arith.addf %43, %43 : vector<8x32xf32>
    %cst_25 = arith.constant dense<0.000000e+00> : vector<8x96xf32>
    %45 = tpu.matmul %44, %0, %cst_25 {dimension_numbers = #tpu.dot_dimension_numbers<[1], [0], [0], [1], [0, 0, 1, 1], [], []>} : vector<8x32xf32>, vector<32x96xf32>, vector<8x96xf32> -> vector<8x96xf32>
    %46 = arith.addf %45, %9 : vector<8x96xf32>
    %47 = vector.extract_strided_slice %12 {offsets = [0, 0], sizes = [8, 64], strides = [1, 1]} : vector<8x96xf32> to vector<8x64xf32>
    %48 = vector.extract_strided_slice %46 {offsets = [0, 0], sizes = [8, 64], strides = [1, 1]} : vector<8x96xf32> to vector<8x64xf32>
    %49 = arith.addf %47, %48 : vector<8x64xf32>
    %50 = arith.negf %49 : vector<8x64xf32>
    %51 = math.exp %50 : vector<8x64xf32>
    %cst_26 = arith.constant 1.000000e+00 : f32
    %52 = vector.broadcast %cst_26 : f32 to vector<8x64xf32>
    %53 = arith.addf %52, %51 : vector<8x64xf32>
    %54 = arith.divf %52, %53 : vector<8x64xf32>
    %55 = vector.extract_strided_slice %54 {offsets = [0, 0], sizes = [8, 32], strides = [1, 1]} : vector<8x64xf32> to vector<8x32xf32>
    %56 = vector.extract_strided_slice %54 {offsets = [0, 32], sizes = [8, 32], strides = [1, 1]} : vector<8x64xf32> to vector<8x32xf32>
    %57 = vector.extract_strided_slice %12 {offsets = [0, 64], sizes = [8, 32], strides = [1, 1]} : vector<8x96xf32> to vector<8x32xf32>
    %58 = vector.extract_strided_slice %46 {offsets = [0, 64], sizes = [8, 32], strides = [1, 1]} : vector<8x96xf32> to vector<8x32xf32>
    %59 = arith.mulf %55, %58 : vector<8x32xf32>
    %60 = arith.addf %57, %59 : vector<8x32xf32>
    %61 = math.tanh %60 : vector<8x32xf32>
    %cst_27 = arith.constant 1.000000e+00 : f32
    %62 = vector.broadcast %cst_27 : f32 to vector<8x32xf32>
    %63 = arith.subf %62, %56 : vector<8x32xf32>
    %64 = arith.mulf %63, %61 : vector<8x32xf32>
    %65 = arith.mulf %56, %44 : vector<8x32xf32>
    %66 = arith.addf %64, %65 : vector<8x32xf32>
    %cst_28 = arith.constant dense<0.000000e+00> : vector<8x96xf32>
    %67 = tpu.matmul %44, %13, %cst_28 {dimension_numbers = #tpu.dot_dimension_numbers<[1], [0], [0], [1], [0, 0, 1, 1], [], []>} : vector<8x32xf32>, vector<32x96xf32>, vector<8x96xf32> -> vector<8x96xf32>
    %68 = arith.addf %67, %18 : vector<8x96xf32>
    %cst_29 = arith.constant dense<0.000000e+00> : vector<8x96xf32>
    %69 = tpu.matmul %66, %0, %cst_29 {dimension_numbers = #tpu.dot_dimension_numbers<[1], [0], [0], [1], [0, 0, 1, 1], [], []>} : vector<8x32xf32>, vector<32x96xf32>, vector<8x96xf32> -> vector<8x96xf32>
    %70 = arith.addf %69, %9 : vector<8x96xf32>
    %71 = vector.extract_strided_slice %68 {offsets = [0, 0], sizes = [8, 64], strides = [1, 1]} : vector<8x96xf32> to vector<8x64xf32>
    %72 = vector.extract_strided_slice %70 {offsets = [0, 0], sizes = [8, 64], strides = [1, 1]} : vector<8x96xf32> to vector<8x64xf32>
    %73 = arith.addf %71, %72 : vector<8x64xf32>
    %74 = arith.negf %73 : vector<8x64xf32>
    %75 = math.exp %74 : vector<8x64xf32>
    %cst_30 = arith.constant 1.000000e+00 : f32
    %76 = vector.broadcast %cst_30 : f32 to vector<8x64xf32>
    %77 = arith.addf %76, %75 : vector<8x64xf32>
    %78 = arith.divf %76, %77 : vector<8x64xf32>
    %79 = vector.extract_strided_slice %78 {offsets = [0, 0], sizes = [8, 32], strides = [1, 1]} : vector<8x64xf32> to vector<8x32xf32>
    %80 = vector.extract_strided_slice %78 {offsets = [0, 32], sizes = [8, 32], strides = [1, 1]} : vector<8x64xf32> to vector<8x32xf32>
    %81 = vector.extract_strided_slice %68 {offsets = [0, 64], sizes = [8, 32], strides = [1, 1]} : vector<8x96xf32> to vector<8x32xf32>
    %82 = vector.extract_strided_slice %70 {offsets = [0, 64], sizes = [8, 32], strides = [1, 1]} : vector<8x96xf32> to vector<8x32xf32>
    %83 = arith.mulf %79, %82 : vector<8x32xf32>
    %84 = arith.addf %81, %83 : vector<8x32xf32>
    %85 = math.tanh %84 : vector<8x32xf32>
    %cst_31 = arith.constant 1.000000e+00 : f32
    %86 = vector.broadcast %cst_31 : f32 to vector<8x32xf32>
    %87 = arith.subf %86, %80 : vector<8x32xf32>
    %88 = arith.mulf %87, %85 : vector<8x32xf32>
    %89 = arith.mulf %80, %66 : vector<8x32xf32>
    %90 = arith.addf %88, %89 : vector<8x32xf32>
    %cst_32 = arith.constant dense<0.000000e+00> : vector<8x96xf32>
    %91 = tpu.matmul %66, %13, %cst_32 {dimension_numbers = #tpu.dot_dimension_numbers<[1], [0], [0], [1], [0, 0, 1, 1], [], []>} : vector<8x32xf32>, vector<32x96xf32>, vector<8x96xf32> -> vector<8x96xf32>
    %92 = arith.addf %91, %18 : vector<8x96xf32>
    %93 = vector.extract_strided_slice %92 {offsets = [0, 0], sizes = [8, 64], strides = [1, 1]} : vector<8x96xf32> to vector<8x64xf32>
    %94 = vector.extract_strided_slice %9 {offsets = [0, 0], sizes = [8, 64], strides = [1, 1]} : vector<8x96xf32> to vector<8x64xf32>
    %95 = arith.addf %93, %94 : vector<8x64xf32>
    %96 = arith.negf %95 : vector<8x64xf32>
    %97 = math.exp %96 : vector<8x64xf32>
    %cst_33 = arith.constant 1.000000e+00 : f32
    %98 = vector.broadcast %cst_33 : f32 to vector<8x64xf32>
    %99 = arith.addf %98, %97 : vector<8x64xf32>
    %100 = arith.divf %98, %99 : vector<8x64xf32>
    %101 = vector.extract_strided_slice %100 {offsets = [0, 0], sizes = [8, 32], strides = [1, 1]} : vector<8x64xf32> to vector<8x32xf32>
    %102 = vector.extract_strided_slice %100 {offsets = [0, 32], sizes = [8, 32], strides = [1, 1]} : vector<8x64xf32> to vector<8x32xf32>
    %103 = vector.extract_strided_slice %92 {offsets = [0, 64], sizes = [8, 32], strides = [1, 1]} : vector<8x96xf32> to vector<8x32xf32>
    %104 = vector.extract_strided_slice %9 {offsets = [0, 64], sizes = [8, 32], strides = [1, 1]} : vector<8x96xf32> to vector<8x32xf32>
    %105 = arith.mulf %101, %104 : vector<8x32xf32>
    %106 = arith.addf %103, %105 : vector<8x32xf32>
    %107 = math.tanh %106 : vector<8x32xf32>
    %cst_34 = arith.constant 1.000000e+00 : f32
    %108 = vector.broadcast %cst_34 : f32 to vector<8x32xf32>
    %109 = arith.subf %108, %102 : vector<8x32xf32>
    %110 = arith.mulf %109, %107 : vector<8x32xf32>
    %cst_35 = arith.constant dense<0.000000e+00> : vector<8x96xf32>
    %111 = tpu.matmul %90, %13, %cst_35 {dimension_numbers = #tpu.dot_dimension_numbers<[1], [0], [0], [1], [0, 0, 1, 1], [], []>} : vector<8x32xf32>, vector<32x96xf32>, vector<8x96xf32> -> vector<8x96xf32>
    %112 = arith.addf %111, %18 : vector<8x96xf32>
    %cst_36 = arith.constant dense<0.000000e+00> : vector<8x96xf32>
    %113 = tpu.matmul %110, %0, %cst_36 {dimension_numbers = #tpu.dot_dimension_numbers<[1], [0], [0], [1], [0, 0, 1, 1], [], []>} : vector<8x32xf32>, vector<32x96xf32>, vector<8x96xf32> -> vector<8x96xf32>
    %114 = arith.addf %113, %9 : vector<8x96xf32>
    %115 = vector.extract_strided_slice %112 {offsets = [0, 0], sizes = [8, 64], strides = [1, 1]} : vector<8x96xf32> to vector<8x64xf32>
    %116 = vector.extract_strided_slice %114 {offsets = [0, 0], sizes = [8, 64], strides = [1, 1]} : vector<8x96xf32> to vector<8x64xf32>
    %117 = arith.addf %115, %116 : vector<8x64xf32>
    %118 = arith.negf %117 : vector<8x64xf32>
    %119 = math.exp %118 : vector<8x64xf32>
    %cst_37 = arith.constant 1.000000e+00 : f32
    %120 = vector.broadcast %cst_37 : f32 to vector<8x64xf32>
    %121 = arith.addf %120, %119 : vector<8x64xf32>
    %122 = arith.divf %120, %121 : vector<8x64xf32>
    %123 = vector.extract_strided_slice %122 {offsets = [0, 0], sizes = [8, 32], strides = [1, 1]} : vector<8x64xf32> to vector<8x32xf32>
    %124 = vector.extract_strided_slice %122 {offsets = [0, 32], sizes = [8, 32], strides = [1, 1]} : vector<8x64xf32> to vector<8x32xf32>
    %125 = vector.extract_strided_slice %112 {offsets = [0, 64], sizes = [8, 32], strides = [1, 1]} : vector<8x96xf32> to vector<8x32xf32>
    %126 = vector.extract_strided_slice %114 {offsets = [0, 64], sizes = [8, 32], strides = [1, 1]} : vector<8x96xf32> to vector<8x32xf32>
    %127 = arith.mulf %123, %126 : vector<8x32xf32>
    %128 = arith.addf %125, %127 : vector<8x32xf32>
    %129 = math.tanh %128 : vector<8x32xf32>
    %cst_38 = arith.constant 1.000000e+00 : f32
    %130 = vector.broadcast %cst_38 : f32 to vector<8x32xf32>
    %131 = arith.subf %130, %124 : vector<8x32xf32>
    %132 = arith.mulf %131, %129 : vector<8x32xf32>
    %133 = arith.mulf %124, %110 : vector<8x32xf32>
    %134 = arith.addf %132, %133 : vector<8x32xf32>
    %cst_39 = arith.constant dense<0.000000e+00> : vector<8x96xf32>
    %135 = tpu.matmul %110, %13, %cst_39 {dimension_numbers = #tpu.dot_dimension_numbers<[1], [0], [0], [1], [0, 0, 1, 1], [], []>} : vector<8x32xf32>, vector<32x96xf32>, vector<8x96xf32> -> vector<8x96xf32>
    %136 = arith.addf %135, %18 : vector<8x96xf32>
    %137 = vector.extract_strided_slice %136 {offsets = [0, 0], sizes = [8, 64], strides = [1, 1]} : vector<8x96xf32> to vector<8x64xf32>
    %138 = vector.extract_strided_slice %9 {offsets = [0, 0], sizes = [8, 64], strides = [1, 1]} : vector<8x96xf32> to vector<8x64xf32>
    %139 = arith.addf %137, %138 : vector<8x64xf32>
    %140 = arith.negf %139 : vector<8x64xf32>
    %141 = math.exp %140 : vector<8x64xf32>
    %cst_40 = arith.constant 1.000000e+00 : f32
    %142 = vector.broadcast %cst_40 : f32 to vector<8x64xf32>
    %143 = arith.addf %142, %141 : vector<8x64xf32>
    %144 = arith.divf %142, %143 : vector<8x64xf32>
    %145 = vector.extract_strided_slice %144 {offsets = [0, 0], sizes = [8, 32], strides = [1, 1]} : vector<8x64xf32> to vector<8x32xf32>
    %146 = vector.extract_strided_slice %144 {offsets = [0, 32], sizes = [8, 32], strides = [1, 1]} : vector<8x64xf32> to vector<8x32xf32>
    %147 = vector.extract_strided_slice %136 {offsets = [0, 64], sizes = [8, 32], strides = [1, 1]} : vector<8x96xf32> to vector<8x32xf32>
    %148 = vector.extract_strided_slice %9 {offsets = [0, 64], sizes = [8, 32], strides = [1, 1]} : vector<8x96xf32> to vector<8x32xf32>
    %149 = arith.mulf %145, %148 : vector<8x32xf32>
    %150 = arith.addf %147, %149 : vector<8x32xf32>
    %151 = math.tanh %150 : vector<8x32xf32>
    %cst_41 = arith.constant 1.000000e+00 : f32
    %152 = vector.broadcast %cst_41 : f32 to vector<8x32xf32>
    %153 = arith.subf %152, %146 : vector<8x32xf32>
    %154 = arith.mulf %153, %151 : vector<8x32xf32>
    %cst_42 = arith.constant dense<0.000000e+00> : vector<8x96xf32>
    %155 = tpu.matmul %134, %13, %cst_42 {dimension_numbers = #tpu.dot_dimension_numbers<[1], [0], [0], [1], [0, 0, 1, 1], [], []>} : vector<8x32xf32>, vector<32x96xf32>, vector<8x96xf32> -> vector<8x96xf32>
    %156 = arith.addf %155, %18 : vector<8x96xf32>
    %157 = arith.addf %154, %66 : vector<8x32xf32>
    %cst_43 = arith.constant dense<0.000000e+00> : vector<8x96xf32>
    %158 = tpu.matmul %157, %0, %cst_43 {dimension_numbers = #tpu.dot_dimension_numbers<[1], [0], [0], [1], [0, 0, 1, 1], [], []>} : vector<8x32xf32>, vector<32x96xf32>, vector<8x96xf32> -> vector<8x96xf32>
    %159 = arith.addf %158, %9 : vector<8x96xf32>
    %160 = vector.extract_strided_slice %156 {offsets = [0, 0], sizes = [8, 64], strides = [1, 1]} : vector<8x96xf32> to vector<8x64xf32>
    %161 = vector.extract_strided_slice %159 {offsets = [0, 0], sizes = [8, 64], strides = [1, 1]} : vector<8x96xf32> to vector<8x64xf32>
    %162 = arith.addf %160, %161 : vector<8x64xf32>
    %163 = arith.negf %162 : vector<8x64xf32>
    %164 = math.exp %163 : vector<8x64xf32>
    %cst_44 = arith.constant 1.000000e+00 : f32
    %165 = vector.broadcast %cst_44 : f32 to vector<8x64xf32>
    %166 = arith.addf %165, %164 : vector<8x64xf32>
    %167 = arith.divf %165, %166 : vector<8x64xf32>
    %168 = vector.extract_strided_slice %167 {offsets = [0, 0], sizes = [8, 32], strides = [1, 1]} : vector<8x64xf32> to vector<8x32xf32>
    %169 = vector.extract_strided_slice %167 {offsets = [0, 32], sizes = [8, 32], strides = [1, 1]} : vector<8x64xf32> to vector<8x32xf32>
    %170 = vector.extract_strided_slice %156 {offsets = [0, 64], sizes = [8, 32], strides = [1, 1]} : vector<8x96xf32> to vector<8x32xf32>
    %171 = vector.extract_strided_slice %159 {offsets = [0, 64], sizes = [8, 32], strides = [1, 1]} : vector<8x96xf32> to vector<8x32xf32>
    %172 = arith.mulf %168, %171 : vector<8x32xf32>
    %173 = arith.addf %170, %172 : vector<8x32xf32>
    %174 = math.tanh %173 : vector<8x32xf32>
    %cst_45 = arith.constant 1.000000e+00 : f32
    %175 = vector.broadcast %cst_45 : f32 to vector<8x32xf32>
    %176 = arith.subf %175, %169 : vector<8x32xf32>
    %177 = arith.mulf %176, %174 : vector<8x32xf32>
    %178 = arith.mulf %169, %157 : vector<8x32xf32>
    %179 = arith.addf %177, %178 : vector<8x32xf32>
    %180 = arith.addf %154, %90 : vector<8x32xf32>
    %cst_46 = arith.constant dense<0.000000e+00> : vector<8x96xf32>
    %181 = tpu.matmul %180, %13, %cst_46 {dimension_numbers = #tpu.dot_dimension_numbers<[1], [0], [0], [1], [0, 0, 1, 1], [], []>} : vector<8x32xf32>, vector<32x96xf32>, vector<8x96xf32> -> vector<8x96xf32>
    %182 = arith.addf %181, %18 : vector<8x96xf32>
    %cst_47 = arith.constant dense<0.000000e+00> : vector<8x96xf32>
    %183 = tpu.matmul %179, %0, %cst_47 {dimension_numbers = #tpu.dot_dimension_numbers<[1], [0], [0], [1], [0, 0, 1, 1], [], []>} : vector<8x32xf32>, vector<32x96xf32>, vector<8x96xf32> -> vector<8x96xf32>
    %184 = arith.addf %183, %9 : vector<8x96xf32>
    %185 = vector.extract_strided_slice %182 {offsets = [0, 0], sizes = [8, 64], strides = [1, 1]} : vector<8x96xf32> to vector<8x64xf32>
    %186 = vector.extract_strided_slice %184 {offsets = [0, 0], sizes = [8, 64], strides = [1, 1]} : vector<8x96xf32> to vector<8x64xf32>
    %187 = arith.addf %185, %186 : vector<8x64xf32>
    %188 = arith.negf %187 : vector<8x64xf32>
    %189 = math.exp %188 : vector<8x64xf32>
    %cst_48 = arith.constant 1.000000e+00 : f32
    %190 = vector.broadcast %cst_48 : f32 to vector<8x64xf32>
    %191 = arith.addf %190, %189 : vector<8x64xf32>
    %192 = arith.divf %190, %191 : vector<8x64xf32>
    %193 = vector.extract_strided_slice %192 {offsets = [0, 0], sizes = [8, 32], strides = [1, 1]} : vector<8x64xf32> to vector<8x32xf32>
    %194 = vector.extract_strided_slice %192 {offsets = [0, 32], sizes = [8, 32], strides = [1, 1]} : vector<8x64xf32> to vector<8x32xf32>
    %195 = vector.extract_strided_slice %182 {offsets = [0, 64], sizes = [8, 32], strides = [1, 1]} : vector<8x96xf32> to vector<8x32xf32>
    %196 = vector.extract_strided_slice %184 {offsets = [0, 64], sizes = [8, 32], strides = [1, 1]} : vector<8x96xf32> to vector<8x32xf32>
    %197 = arith.mulf %193, %196 : vector<8x32xf32>
    %198 = arith.addf %195, %197 : vector<8x32xf32>
    %199 = math.tanh %198 : vector<8x32xf32>
    %cst_49 = arith.constant 1.000000e+00 : f32
    %200 = vector.broadcast %cst_49 : f32 to vector<8x32xf32>
    %201 = arith.subf %200, %194 : vector<8x32xf32>
    %202 = arith.mulf %201, %199 : vector<8x32xf32>
    %203 = arith.mulf %194, %179 : vector<8x32xf32>
    %204 = arith.addf %202, %203 : vector<8x32xf32>
    %205 = arith.addf %179, %134 : vector<8x32xf32>
    %206 = arith.addf %204, %179 : vector<8x32xf32>
    %207 = tpu.concatenate %44, %66, %90, %110, %134, %180, %205, %206 in 0 : vector<8x32xf32>, vector<8x32xf32>, vector<8x32xf32>, vector<8x32xf32>, vector<8x32xf32>, vector<8x32xf32>, vector<8x32xf32>, vector<8x32xf32> -> vector<64x32xf32>
    %cst_50 = arith.constant dense<0.000000e+00> : vector<64x4xf32>
    %208 = tpu.matmul %207, %2, %cst_50 {dimension_numbers = #tpu.dot_dimension_numbers<[1], [0], [0], [1], [0, 0, 1, 1], [], []>} : vector<64x32xf32>, vector<32x4xf32>, vector<64x4xf32> -> vector<64x4xf32>
    %209 = vector.broadcast %3 : vector<1x4xf32> to vector<64x4xf32>
    %210 = arith.addf %208, %209 : vector<64x4xf32>
    %c0_51 = arith.constant 0 : index
    %c0_52 = arith.constant 0 : index
    %211 = vector.load %arg11[%c0_51, %c0_52] : memref<64x4xf32, #tpu.memory_space<vmem>>, vector<64x4xf32>
    tpu.vector_store %arg11[%c0_51, %c0_52], %210 {strides = array<i32>} : memref<64x4xf32, #tpu.memory_space<vmem>>, vector<64x4xf32>,
    return
  }
}

</mosaic_0001>

<bundles_post_ra>
// kernel: rae_forward.1
= control target key start
LH: loop header
LB: loop body
LE: loop exit
PB: predicated region body
PF: predicated region fallthrough
CT: control target
= control target key end

     0   :  { %vm70_vm0 = vcmask 1043456   ;;  %vm57_vm1 = vcmask 31744   ;;  %v1882_v0 = vmov 0.0   ;;  %vm1883_vm2 = vmmov 0   ;;  %s1884_s27 = smov 64   ;;  %s2349_s5 = inlined_call_operand.vmem [shape: f32[4,96], index: 5, kind: input, shape index: {}]   ;;  %s2350_s10 = inlined_call_operand.vmem [shape: f32[1,4], index: 10, kind: input, shape index: {}]   ;;  %s2351_s1 = inlined_call_operand.vmem [shape: f32[4,96], index: 1, kind: input, shape index: {}]   ;;  %s2352_s0 = inlined_call_operand.vmem [shape: f32[64,4], index: 0, kind: input, shape index: {}]   ;;  %s2353_s2 = inlined_call_operand.vmem [shape: f32[32,96], index: 2, kind: input, shape index: {}]   ;;  %s2354_s4 = inlined_call_operand.vmem [shape: f32[1,96], index: 4, kind: input, shape index: {}]   ;;  %s2355_s3 = inlined_call_operand.vmem [shape: f32[1,96], index: 3, kind: input, shape index: {}]   ;;  %s2356_s9 = inlined_call_operand.vmem [shape: f32[32,4], index: 9, kind: input, shape index: {}]   ;;  %s2357_s6 = inlined_call_operand.vmem [shape: f32[32,96], index: 6, kind: input, shape index: {}]   ;;  %s2358_s8 = inlined_call_operand.vmem [shape: f32[1,96], index: 8, kind: input, shape index: {}]   ;;  %s2359_s7 = inlined_call_operand.vmem [shape: f32[1,96], index: 7, kind: input, shape index: {}]   ;;  %s2360_s11 = inlined_call_operand.vmem [shape: f32[64,4], index: 11, kind: output, shape index: {}]  }
   0x1   :  { %1670 = vmatprep.subr.mxu1 %v1882_v0  ;;  %v42_v1 = vld [vmem:[%s2349_s5] sm:$0xf]  ;;  %1672 = vmatprep.mubr.msk.f32.mxu1 %vm1883_vm2, %v1882_v0  ;;  %v237_v5 = vld [vmem:[%s2352_s0 + $0x8] sm:$0xff]  ;;  %v238_v7 = vld [vmem:[%s2352_s0 + $0x10] sm:$0xff]  ;;  %vm410_vm3 = vcmask 261120   ;;  %v232_v58 = vlaneseq }
   0x2   :  { %v1955_v2 = vld [vmem:[%s2350_s10] sm:$0x1]  ;;  %1671 = vmatpush3.msk.msra.mxu1 %vm70_vm0, %v42_v1  ;;  %1662 = vmatprep.subr.msk.mxu0 %vm70_vm0, %v42_v1  ;;  %v239_v8 = vld [vmem:[%s2352_s0 + $0x18] sm:$0xff]  ;;  %v241_v10 = vld [vmem:[%s2352_s0 + $0x28] sm:$0xff] }
   0x3   :  { %v244_v3 = vld [vmem:[%s2351_s1] sm:$0xf]  ;;  %1673 = vmatmul.mubr.msk.f32.vlgmr.msra.gmra.mxu1 %vm57_vm1, %v1955_v2  ;;  %1663 = vmatpush3.msk.msra.mxu0 %vm70_vm0, %v42_v1  ;;  %v242_v11 = vld [vmem:[%s2352_s0 + $0x30] sm:$0xff]  ;;  %v243_v12 = vld [vmem:[%s2352_s0 + $0x38] sm:$0xff]  ;;  %v233_v59 = vshrl.u32 %v232_v58, 7 }
   0x4   :  { %v236_v4 = vld [vmem:[%s2352_s0] sm:$0xff]  ;;  %1675 = vmatprep.subr.msk.mxu1 %vm70_vm0, %v244_v3  ;;  %1700 = vmatprep.subr.mxu0 %v1882_v0  ;;  %v2021_v33 = vld [vmem:[%s2356_s9 + $0x8] sm:$0xff]  ;;  %v2026_v34 = vld [vmem:[%s2356_s9 + $0x10] sm:$0xff] }
   0x5   :  { %1676 = vmatpush3.msk.msra.mxu1 %vm70_vm0, %v244_v3  ;;  %1677 = vmatprep.mubr.msk.f32.mxu1 %vm57_vm1, %v236_v4  ;;  %v1551_v6 = vld [vmem:[%s2354_s4] ss:$0 sm:$0xff]  ;;  %v2037_v35 = vld [vmem:[%s2356_s9 + $0x18] sm:$0xff]  ;;  %v2051_v39 = vld [vmem:[%s2357_s6 + $0x10] sm:$0xff]  ;;  %s1885_s4 = smov 96   ;;  %v2124_v60 = vsub.s32 0, %v233_v59 }
   0x6   :  { %390 = vrot.lane.b32.xlu0 %v1551_v6, %s1884_s27  ;;  %1689 = vmatprep.subr.mxu1 %v1882_v0  ;;  %v240_v9 = vld [vmem:[%s2352_s0 + $0x20] sm:$0xff]  ;;  %v2046_v38 = vld [vmem:[%s2357_s6 + $0x18] sm:$0xff]  ;;  %v2058_v40 = vld [vmem:[%s2357_s6 + $0x8] sm:$0xff] }
   0x7   :  { %1678 = vmatmul.mubr.msk.f32.vlgmr.msra.gmra.mxu1 %vm57_vm1, %v237_v5  ;;  %v1541_v21 = vld [vmem:[%s2355_s3] ss:$0 sm:$0xff] }
   0x8   :  { %1680 = vmatprep.mubr.msk.f32.mxu1 %vm57_vm1, %v238_v7  ;;  %v2016_v32 = vld [vmem:[%s2356_s9] sm:$0xff]  ;;  %1690 = vmatpush3.msra.mxu1 %v2046_v38 }
   0x9   :  { %1664 = vmatprep.mubr.msk.f32.mxu0 %vm57_vm1, %v2016_v32  ;;  %1691 = vmatprep.subr.mxu1 %v1882_v0  ;;  %v2065_v41 = vld [vmem:[%s2357_s6] sm:$0xff] }
   0xa   :  { %1665 = vmatmul.mubr.msk.f32.vlgmr.msra.gmra.mxu0 %vm57_vm1, %v2021_v33  ;;  %1692 = vmatpush3.msra.mxu1 %v2051_v39  ;;  %v2118_v52 = vld [vmem:[%s2358_s8] ss:$0 sm:$0xff] }
   0xb   :  { %1681 = vmatmul.mubr.msk.f32.gmra.mxu1 %vm57_vm1, %v239_v8  ;;  %1667 = vmatprep.mubr.msk.f32.mxu0 %vm57_vm1, %v2026_v34  ;;  %v56_v61 = vld [vmem:[%s2359_s7] sm:$0x1] }
   0xc   :  { %1683 = vmatprep.mubr.msk.f32.mxu1 %vm57_vm1, %v240_v9  ;;  %1693 = vmatprep.subr.mxu1 %v1882_v0  ;;  %v487_v62 = vrot.slane %v56_v61, %v2124_v60 }
   0xd   :  { %1694 = vmatpush3.msra.mxu1 %v2058_v40 }
   0xe   :  { %1668 = vmatmul.mubr.msk.f32.gmra.mxu0 %vm57_vm1, %v2037_v35  ;;  %1695 = vmatprep.subr.mxu1 %v1882_v0 }
   0xf   :  { %1684 = vmatmul.mubr.msk.f32.gmra.mxu1 %vm57_vm1, %v241_v10  ;;  %1708 = vmatprep.mubr.msk.f32.mxu0 %vm1883_vm2, %v1882_v0 }
  0x10   :  { %1686 = vmatprep.mubr.msk.f32.mxu1 %vm57_vm1, %v242_v11  ;;  %1696 = vmatpush3.msra.mxu1 %v2065_v41 }
  0x11   :  { %1711 = vmatprep.subr.mxu1 %v1882_v0 }
  0x13   :  { %1687 = vmatmul.mubr.msk.f32.gmra.mxu1 %vm57_vm1, %v243_v12 }
  0x14   :  { %1697 = vmatprep.mubr.msk.f32.mxu1 %vm1883_vm2, %v1882_v0 }
  0x78   :  { %v391_v29 = vpop.permute.xlu0 %390 }
  0xc3   :  { %v2007_v13 = vpop.f32.mrf.mxu1 }
  0xc5   :  { %v1674_v14 = vpop.f32.mrf.mxu1 }
  0xc7   :  { %v1679_v15 = vpop.f32.mrf.mxu1 }
  0xc9   :  { %v345_v16 = vpop.f32.mrf.mxu1 }
  0xca   :  { %v2072_v43 = vpop.f32.mrf.mxu0 }
  0xcb   :  { %v1682_v17 = vpop.f32.mrf.mxu1 }
  0xcc   :  { %v2074_v44 = vpop.f32.mrf.mxu0 }
  0xcd   :  { %v353_v18 = vpop.f32.mrf.mxu1 }
  0xce   :  { %v2076_v45 = vpop.f32.mrf.mxu0  ;;  %v229_v18 = vadd.f32 %v2007_v13, %v56_v61 }
  0xcf   :  { %v1685_v19 = vpop.f32.mrf.mxu1  ;;  %1701 = vmatpush3.msra.mxu0 %v2076_v45 }
  0xd0   :  { %v2079_v46 = vpop.f32.mrf.mxu0  ;;  %1702 = vmatprep.subr.mxu0 %v1882_v0  ;;  %v2166_v19 = vrot.slane %v229_v18, %v2124_v60 }
  0xd1   :  { %v361_v20 = vpop.f32.mrf.mxu1  ;;  %1703 = vmatpush3.msra.mxu0 %v2079_v46 }
  0xd2   :  { %1704 = vmatprep.subr.mxu0 %v1882_v0 }
  0xd3   :  { %v1688_v22 = vpop.f32.mrf.mxu1  ;;  %1705 = vmatpush3.msra.mxu0 %v2072_v43 }
  0xd4   :  { %v374_v23 = vadd.f32 %v1688_v22, %v1541_v21  ;;  %1706 = vmatprep.subr.mxu0 %v1882_v0 }
  0xd5   :  { %v369_v24 = vpop.f32.mrf.mxu1  ;;  %1707 = vmatpush3.msra.mxu0 %v2074_v44 }
  0xd6   :  { %v383_v25 = vadd.f32 %v1551_v6, %v374_v23  ;;  %1722 = vmatprep.subr.mxu0 %v1882_v0 }
  0xd8   :  { %v1552_v26 = vmul.f32 -1.442695, %v383_v25 }
  0xda   :  { %1834 = vpow2.f32 %v1552_v26 }
  0xe7   :  { %v1835_v27 = vpop.eup %1834 }
  0xe8   :  { %v387_v28 = vadd.f32 1.0, %v1835_v27 }
  0xea   :  { %1836 = vrcp.f32 %v387_v28 }
  0xf7   :  { %v1837_v30 = vpop.eup %1836 }
  0xf8   :  { %v393_v31 = vmul.f32 %v1837_v30, %v391_v29  ;;  %v400_v47 = vsub.f32 1.0, %v1837_v30 }
  0xfa   :  { %395 = vrot.lane.b32.xlu0 %v393_v31, %s1884_s27 }
 0x16c   :  { %v396_v36 = vpop.permute.xlu0 %395 }
 0x16d   :  { %v398_v37 = vadd.f32 %v396_v36, %v374_v23 }
 0x16f   :  { %1838 = vtanh.f32 %v398_v37 }
 0x17c   :  { %v1839_v42 = vpop.eup %1838 }
 0x17d   :  { %402 = vrot.lane.b32.xlu1 %v1839_v42, %s1885_s4 }
 0x1ef   :  { %v403_v48 = vpop.permute.xlu1 %402 }
 0x1f0   :  { %v405_v49 = vmul.f32 %v403_v48, %v400_v47 }
 0x1f2   :  { %v406_v50 = vadd.f32 %v405_v49, %v405_v49 }
 0x1f4   :  { %408 = vrot.lane.b32.xlu1 %v406_v50, %s1885_s4 }
 0x266   :  { %v2089_v51 = vpop.permute.xlu1 %408 }
 0x267   :  { %1698 = vmatmul.mubr.msk.f32.vlgmr.msra.gmra.mxu1 %vm410_vm3, %v2089_v51  ;;  %1709 = vmatmul.mubr.msk.f32.vlgmr.msra.gmra.mxu0 %vm410_vm3, %v2089_v51 }
 0x268   :  { %1712 = vmatpush3.msra.mxu1 %v2046_v38  ;;  %1723 = vmatpush3.msra.mxu0 %v2076_v45 }
 0x269   :  { %1713 = vmatprep.subr.mxu1 %v1882_v0  ;;  %1724 = vmatprep.subr.mxu0 %v1882_v0 }
 0x26a   :  { %1714 = vmatpush3.msra.mxu1 %v2051_v39  ;;  %1725 = vmatpush3.msra.mxu0 %v2079_v46 }
 0x26b   :  { %1715 = vmatprep.subr.mxu1 %v1882_v0  ;;  %1726 = vmatprep.subr.mxu0 %v1882_v0 }
 0x26c   :  { %1716 = vmatpush3.msra.mxu1 %v2058_v40  ;;  %1727 = vmatpush3.msra.mxu0 %v2072_v43 }
 0x26d   :  { %1717 = vmatprep.subr.mxu1 %v1882_v0  ;;  %1728 = vmatprep.subr.mxu0 %v1882_v0 }
 0x26e   :  { %1718 = vmatpush3.msra.mxu1 %v2065_v41  ;;  %1719 = vmatprep.mubr.msk.f32.mxu1 %vm1883_vm2, %v1882_v0 }
 0x26f   :  { %1729 = vmatpush3.msra.mxu0 %v2074_v44  ;;  %1730 = vmatprep.mubr.msk.f32.mxu0 %vm1883_vm2, %v1882_v0 }
 0x270   :  { %1733 = vmatprep.subr.mxu1 %v1882_v0  ;;  %1744 = vmatprep.subr.mxu0 %v1882_v0 }
 0x327   :  { %v479_v53 = vpop.f32.mrf.mxu1  ;;  %v2120_v54 = vpop.f32.mrf.mxu0 }
 0x328   :  { %v480_v55 = vadd.f32 %v2118_v52, %v479_v53  ;;  %v582_v36 = vadd.f32 %v2120_v54, %v2166_v19 }
 0x329   :  { %v1699_v56 = vpop.f32.mrf.mxu1  ;;  %v1710_v57 = vpop.f32.mrf.mxu0 }
 0x32a   :  { %497 = vrot.lane.b32.xlu0 %v480_v55, %s1884_s27  ;;  %v489_v63 = vadd.f32 %v487_v62, %v480_v55 }
 0x32c   :  { %v1554_v1 = vmul.f32 -1.442695, %v489_v63 }
 0x32e   :  { %1840 = vpow2.f32 %v1554_v1 }
 0x33b   :  { %v1841_v3 = vpop.eup %1840 }
 0x33c   :  { %v493_v4 = vadd.f32 1.0, %v1841_v3 }
 0x33e   :  { %1842 = vrcp.f32 %v493_v4 }
 0x34b   :  { %v1843_v5 = vpop.eup %1842 }
 0x34c   :  { %v507_v11 = vsub.f32 1.0, %v1843_v5  ;;  %v513_v14 = vmul.f32 %v1843_v5, %v406_v50 }
 0x39c   :  { %v498_v6 = vpop.permute.xlu0 %497 }
 0x39d   :  { %v500_v7 = vmul.f32 %v1843_v5, %v498_v6 }
 0x39f   :  { %502 = vrot.lane.b32.xlu1 %v500_v7, %s1884_s27 }
 0x411   :  { %v503_v8 = vpop.permute.xlu1 %502 }
 0x412   :  { %v505_v9 = vadd.f32 %v503_v8, %v487_v62 }
 0x414   :  { %1844 = vtanh.f32 %v505_v9 }
 0x421   :  { %v1845_v10 = vpop.eup %1844 }
 0x422   :  { %509 = vrot.lane.b32.xlu0 %v1845_v10, %s1885_s4 }
 0x494   :  { %v510_v12 = vpop.permute.xlu0 %509 }
 0x495   :  { %v512_v15 = vmul.f32 %v510_v12, %v507_v11 }
 0x497   :  { %v2132_v16 = vadd.f32 %v513_v14, %v512_v15 }
 0x499   :  { %586 = vrot.lane.b32.xlu1 %v2132_v16, %s1885_s4 }
 0x49d   :  { %763 = vrot.lane.b32.xlu1 %v2118_v52, %s1884_s27 }
 0x50b   :  { %v2138_v17 = vpop.permute.xlu1 %586 }
 0x50c   :  { %1720 = vmatmul.mubr.msk.f32.vlgmr.msra.gmra.mxu1 %vm410_vm3, %v2138_v17  ;;  %1731 = vmatmul.mubr.msk.f32.vlgmr.msra.gmra.mxu0 %vm410_vm3, %v2138_v17 }
 0x50d   :  { %1734 = vmatpush3.msra.mxu1 %v2076_v45  ;;  %1745 = vmatpush3.msra.mxu0 %v2046_v38 }
 0x50e   :  { %1735 = vmatprep.subr.mxu1 %v1882_v0  ;;  %1746 = vmatprep.subr.mxu0 %v1882_v0 }
 0x50f   :  { %1736 = vmatpush3.msra.mxu1 %v2079_v46  ;;  %1747 = vmatpush3.msra.mxu0 %v2051_v39  ;;  %v2172_v13 = vpop.permute.xlu1 %763 }
 0x510   :  { %1737 = vmatprep.subr.mxu1 %v1882_v0  ;;  %1748 = vmatprep.subr.mxu0 %v1882_v0 }
 0x511   :  { %1738 = vmatpush3.msra.mxu1 %v2072_v43  ;;  %1749 = vmatpush3.msra.mxu0 %v2058_v40 }
 0x512   :  { %1739 = vmatprep.subr.mxu1 %v1882_v0  ;;  %1750 = vmatprep.subr.mxu0 %v1882_v0 }
 0x513   :  { %1740 = vmatpush3.msra.mxu1 %v2074_v44  ;;  %1751 = vmatpush3.msra.mxu0 %v2065_v41 }
 0x514   :  { %1752 = vmatprep.mubr.msk.f32.mxu0 %vm1883_vm2, %v1882_v0  ;;  %1766 = vmatprep.subr.mxu0 %v1882_v0 }
 0x515   :  { %1741 = vmatprep.mubr.msk.f32.mxu1 %vm1883_vm2, %v1882_v0  ;;  %1755 = vmatprep.subr.mxu1 %v1882_v0 }
 0x5cc   :  { %v656_v20 = vpop.f32.mrf.mxu1  ;;  %v752_v21 = vpop.f32.mrf.mxu0 }
 0x5cd   :  { %v657_v22 = vadd.f32 %v2118_v52, %v656_v20  ;;  %v753_v23 = vadd.f32 %v752_v21, %v2166_v19 }
 0x5ce   :  { %v1721_v24 = vpop.f32.mrf.mxu1  ;;  %v1732_v25 = vpop.f32.mrf.mxu0 }
 0x5cf   :  { %v756_v26 = vadd.f32 %v2118_v52, %v753_v23  ;;  %668 = vrot.lane.b32.xlu0 %v657_v22, %s1884_s27  ;;  %v660_v37 = vadd.f32 %v657_v22, %v582_v36 }
 0x5d1   :  { %v1559_v27 = vmul.f32 -1.442695, %v756_v26  ;;  %v1557_v42 = vmul.f32 -1.442695, %v660_v37 }
 0x5d3   :  { %1846 = vpow2.f32 %v1559_v27 }
 0x5e0   :  { %v1847_v28 = vpop.eup %1846 }
 0x5e1   :  { %v760_v29 = vadd.f32 1.0, %v1847_v28 }
 0x5e3   :  { %1848 = vrcp.f32 %v760_v29 }
 0x5e4   :  { %1850 = vpow2.f32 %v1557_v42 }
 0x5f0   :  { %v1849_v30 = vpop.eup %1848 }
 0x5f1   :  { %v766_v31 = vmul.f32 %v1849_v30, %v2172_v13  ;;  %v1851_v47 = vpop.eup %1850  ;;  %v773_v61 = vsub.f32 1.0, %v1849_v30 }
 0x5f2   :  { %v664_v48 = vadd.f32 1.0, %v1851_v47 }
 0x5f3   :  { %768 = vrot.lane.b32.xlu1 %v766_v31, %s1884_s27 }
 0x5f4   :  { %1852 = vrcp.f32 %v664_v48 }
 0x601   :  { %v1853_v49 = vpop.eup %1852 }
 0x602   :  { %v678_v1 = vsub.f32 1.0, %v1853_v49  ;;  %v684_v4 = vmul.f32 %v1853_v49, %v2132_v16 }
 0x641   :  { %v669_v50 = vpop.permute.xlu0 %668 }
 0x642   :  { %v671_v53 = vmul.f32 %v1853_v49, %v669_v50 }
 0x644   :  { %673 = vrot.lane.b32.xlu0 %v671_v53, %s1884_s27 }
 0x665   :  { %v769_v55 = vpop.permute.xlu1 %768 }
 0x666   :  { %v771_v56 = vadd.f32 %v769_v55, %v753_v23 }
 0x668   :  { %1854 = vtanh.f32 %v771_v56 }
 0x675   :  { %v1855_v57 = vpop.eup %1854 }
 0x676   :  { %775 = vrot.lane.b32.xlu1 %v1855_v57, %s1885_s4 }
 0x6b6   :  { %v674_v58 = vpop.permute.xlu0 %673 }
 0x6b7   :  { %v676_v59 = vadd.f32 %v674_v58, %v582_v36 }
 0x6b9   :  { %1856 = vtanh.f32 %v676_v59 }
 0x6c6   :  { %v1857_v54 = vpop.eup %1856 }
 0x6c7   :  { %680 = vrot.lane.b32.xlu0 %v1857_v54, %s1885_s4 }
 0x6e8   :  { %v776_v62 = vpop.permute.xlu1 %775 }
 0x6e9   :  { %v2181_v63 = vmul.f32 %v776_v62, %v773_v61 }
 0x6eb   :  { %855 = vrot.lane.b32.xlu1 %v2181_v63, %s1885_s4 }
 0x739   :  { %v681_v3 = vpop.permute.xlu0 %680 }
 0x73a   :  { %v683_v5 = vmul.f32 %v681_v3, %v678_v1 }
 0x73c   :  { %v2186_v6 = vadd.f32 %v684_v4, %v683_v5 }
 0x73e   :  { %780 = vrot.lane.b32.xlu0 %v2186_v6, %s1885_s4 }
 0x75d   :  { %v2190_v7 = vpop.permute.xlu1 %855 }
 0x75e   :  { %1753 = vmatmul.mubr.msk.f32.vlgmr.msra.gmra.mxu0 %vm410_vm3, %v2190_v7 }
 0x75f   :  { %1767 = vmatpush3.msra.mxu0 %v2076_v45  ;;  %1774 = vmatprep.mubr.msk.f32.mxu0 %vm1883_vm2, %v1882_v0 }
 0x760   :  { %1768 = vmatprep.subr.mxu0 %v1882_v0 }
 0x761   :  { %1769 = vmatpush3.msra.mxu0 %v2079_v46 }
 0x762   :  { %1770 = vmatprep.subr.mxu0 %v1882_v0 }
 0x763   :  { %1771 = vmatpush3.msra.mxu0 %v2072_v43 }
 0x764   :  { %1772 = vmatprep.subr.mxu0 %v1882_v0 }
 0x765   :  { %1773 = vmatpush3.msra.mxu0 %v2074_v44 }
 0x766   :  { %1788 = vmatprep.subr.mxu0 %v1882_v0 }
 0x7b0   :  { %v2204_v8 = vpop.permute.xlu0 %780 }
 0x7b1   :  { %1742 = vmatmul.mubr.msk.f32.vlgmr.msra.gmra.mxu1 %vm410_vm3, %v2204_v8 }
 0x7b2   :  { %1756 = vmatpush3.msra.mxu1 %v2076_v45  ;;  %1763 = vmatprep.mubr.msk.f32.mxu1 %vm1883_vm2, %v1882_v0 }
 0x7b3   :  { %1757 = vmatprep.subr.mxu1 %v1882_v0 }
 0x7b4   :  { %1758 = vmatpush3.msra.mxu1 %v2079_v46 }
 0x7b5   :  { %1759 = vmatprep.subr.mxu1 %v1882_v0 }
 0x7b6   :  { %1760 = vmatpush3.msra.mxu1 %v2072_v43 }
 0x7b7   :  { %1761 = vmatprep.subr.mxu1 %v1882_v0 }
 0x7b8   :  { %1762 = vmatpush3.msra.mxu1 %v2074_v44 }
 0x7b9   :  { %1764 = vmatmul.mubr.msk.f32.vlgmr.msra.gmra.mxu1 %vm410_vm3, %v2190_v7  ;;  %1777 = vmatprep.subr.mxu1 %v1882_v0 }
 0x7ba   :  { %1778 = vmatpush3.msra.mxu1 %v2046_v38  ;;  %1785 = vmatprep.mubr.msk.f32.mxu1 %vm1883_vm2, %v1882_v0 }
 0x7bb   :  { %1779 = vmatprep.subr.mxu1 %v1882_v0 }
 0x7bc   :  { %1780 = vmatpush3.msra.mxu1 %v2051_v39 }
 0x7bd   :  { %1781 = vmatprep.subr.mxu1 %v1882_v0 }
 0x7be   :  { %1782 = vmatpush3.msra.mxu1 %v2058_v40 }
 0x7bf   :  { %1783 = vmatprep.subr.mxu1 %v1882_v0 }
 0x7c0   :  { %1784 = vmatpush3.msra.mxu1 %v2065_v41 }
 0x7c1   :  { %1799 = vmatprep.subr.mxu1 %v1882_v0 }
 0x81e   :  { %v925_v9 = vpop.f32.mrf.mxu0 }
 0x81f   :  { %v926_v10 = vadd.f32 %v2118_v52, %v925_v9 }
 0x820   :  { %v1754_v11 = vpop.f32.mrf.mxu0 }
 0x821   :  { %937 = vrot.lane.b32.xlu0 %v926_v10, %s1884_s27 }
 0x871   :  { %v850_v12 = vpop.f32.mrf.mxu1 }
 0x872   :  { %v851_v14 = vadd.f32 %v850_v12, %v2166_v19 }
 0x873   :  { %v1743_v15 = vpop.f32.mrf.mxu1 }
 0x874   :  { %v929_v18 = vadd.f32 %v926_v10, %v851_v14 }
 0x876   :  { %v1562_v20 = vmul.f32 -1.442695, %v929_v18 }
 0x878   :  { %1858 = vpow2.f32 %v1562_v20 }
 0x879   :  { %v1021_v21 = vpop.f32.mrf.mxu1 }
 0x87a   :  { %v1022_v22 = vadd.f32 %v1021_v21, %v2166_v19 }
 0x87b   :  { %v1765_v23 = vpop.f32.mrf.mxu1 }
 0x87c   :  { %v1025_v24 = vadd.f32 %v2118_v52, %v1022_v22 }
 0x87e   :  { %v1564_v25 = vmul.f32 -1.442695, %v1025_v24 }
 0x880   :  { %1860 = vpow2.f32 %v1564_v25 }
 0x885   :  { %v1859_v26 = vpop.eup %1858 }
 0x886   :  { %v933_v27 = vadd.f32 1.0, %v1859_v26 }
 0x888   :  { %1862 = vrcp.f32 %v933_v27 }
 0x88d   :  { %v1861_v28 = vpop.eup %1860 }
 0x88e   :  { %v1029_v29 = vadd.f32 1.0, %v1861_v28 }
 0x890   :  { %1864 = vrcp.f32 %v1029_v29 }
 0x893   :  { %v938_v31 = vpop.permute.xlu0 %937 }
 0x895   :  { %v1863_v30 = vpop.eup %1862 }
 0x896   :  { %v940_v36 = vmul.f32 %v1863_v30, %v938_v31  ;;  %v947_v56 = vsub.f32 1.0, %v1863_v30  ;;  %v953_v58 = vmul.f32 %v1863_v30, %v2181_v63 }
 0x898   :  { %942 = vrot.lane.b32.xlu0 %v940_v36, %s1884_s27 }
 0x89d   :  { %v1865_v37 = vpop.eup %1864 }
 0x89e   :  { %v1032_v42 = vmul.f32 %v1865_v37, %v2172_v13  ;;  %v1039_v54 = vsub.f32 1.0, %v1865_v37 }
 0x8a0   :  { %1034 = vrot.lane.b32.xlu1 %v1032_v42, %s1884_s27 }
 0x90a   :  { %v943_v47 = vpop.permute.xlu0 %942 }
 0x90b   :  { %v945_v48 = vadd.f32 %v943_v47, %v851_v14 }
 0x90d   :  { %1866 = vtanh.f32 %v945_v48 }
 0x912   :  { %v1035_v49 = vpop.permute.xlu1 %1034 }
 0x913   :  { %v1037_v50 = vadd.f32 %v1035_v49, %v1022_v22 }
 0x915   :  { %1868 = vtanh.f32 %v1037_v50 }
 0x91a   :  { %v1867_v53 = vpop.eup %1866 }
 0x91b   :  { %949 = vrot.lane.b32.xlu0 %v1867_v53, %s1885_s4 }
 0x922   :  { %v1869_v55 = vpop.eup %1868 }
 0x923   :  { %1041 = vrot.lane.b32.xlu1 %v1869_v55, %s1885_s4 }
 0x98d   :  { %v950_v57 = vpop.permute.xlu0 %949 }
 0x98e   :  { %v952_v59 = vmul.f32 %v950_v57, %v947_v56 }
 0x990   :  { %v2241_v13 = vadd.f32 %v953_v58, %v952_v59 }
 0x992   :  { %1046 = vrot.lane.b32.xlu0 %v2241_v13, %s1885_s4 }
 0x995   :  { %v1042_v61 = vpop.permute.xlu1 %1041 }
 0x996   :  { %v1044_v62 = vmul.f32 %v1042_v61, %v1039_v54 }
 0x998   :  { %v1120_v1 = vadd.f32 %v1044_v62, %v2132_v16  ;;  %v1222_v14 = vadd.f32 %v1044_v62, %v2186_v6 }
 0x99a   :  { %1122 = vrot.lane.b32.xlu1 %v1120_v1, %s1885_s4 }
 0xa04   :  { %v2247_v3 = vpop.permute.xlu0 %1046 }
 0xa05   :  { %1775 = vmatmul.mubr.msk.f32.vlgmr.msra.gmra.mxu0 %vm410_vm3, %v2247_v3 }
 0xa06   :  { %1789 = vmatpush3.msra.mxu0 %v2076_v45  ;;  %1796 = vmatprep.mubr.msk.f32.mxu0 %vm1883_vm2, %v1882_v0 }
 0xa07   :  { %1790 = vmatprep.subr.mxu0 %v1882_v0 }
 0xa08   :  { %1791 = vmatpush3.msra.mxu0 %v2079_v46 }
 0xa09   :  { %1792 = vmatprep.subr.mxu0 %v1882_v0 }
 0xa0a   :  { %1793 = vmatpush3.msra.mxu0 %v2072_v43 }
 0xa0b   :  { %1794 = vmatprep.subr.mxu0 %v1882_v0 }
 0xa0c   :  { %1795 = vmatpush3.msra.mxu0 %v2074_v44  ;;  %v1123_v16 = vpop.permute.xlu1 %1122 }
 0xa0d   :  { %1786 = vmatmul.mubr.msk.f32.vlgmr.msra.gmra.mxu1 %vm410_vm3, %v1123_v16  ;;  %1810 = vmatprep.subr.mxu0 %v2037_v35 }
 0xa0e   :  { %1800 = vmatpush3.msra.mxu1 %v2046_v38  ;;  %1807 = vmatprep.mubr.msk.f32.mxu1 %vm1883_vm2, %v1882_v0 }
 0xa0f   :  { %1801 = vmatprep.subr.mxu1 %v1882_v0 }
 0xa10   :  { %1802 = vmatpush3.msra.mxu1 %v2051_v39 }
 0xa11   :  { %1803 = vmatprep.subr.mxu1 %v1882_v0 }
 0xa12   :  { %1804 = vmatpush3.msra.mxu1 %v2058_v40 }
 0xa13   :  { %1805 = vmatprep.subr.mxu1 %v1882_v0 }
 0xa14   :  { %1806 = vmatpush3.msra.mxu1 %v2065_v41 }
 0xac5   :  { %v1116_v43 = vpop.f32.mrf.mxu0 }
 0xac6   :  { %v1117_v63 = vadd.f32 %v1116_v43, %v2166_v19 }
 0xac7   :  { %v1776_v44 = vpop.f32.mrf.mxu0 }
 0xacd   :  { %v1192_v45 = vpop.f32.mrf.mxu1 }
 0xace   :  { %v1193_v38 = vadd.f32 %v2118_v52, %v1192_v45 }
 0xacf   :  { %v1787_v46 = vpop.f32.mrf.mxu1 }
 0xad0   :  { %1204 = vrot.lane.b32.xlu1 %v1193_v38, %s1884_s27  ;;  %v1196_v4 = vadd.f32 %v1193_v38, %v1117_v63 }
 0xad2   :  { %v1567_v39 = vmul.f32 -1.442695, %v1196_v4 }
 0xad4   :  { %1870 = vpow2.f32 %v1567_v39 }
 0xae1   :  { %v1871_v5 = vpop.eup %1870 }
 0xae2   :  { %v1200_v9 = vadd.f32 1.0, %v1871_v5 }
 0xae4   :  { %1872 = vrcp.f32 %v1200_v9 }
 0xaf1   :  { %v1873_v40 = vpop.eup %1872 }
 0xaf2   :  { %v1214_v15 = vsub.f32 1.0, %v1873_v40  ;;  %v1220_v20 = vmul.f32 %v1873_v40, %v1120_v1 }
 0xb42   :  { %v1205_v0 = vpop.permute.xlu1 %1204 }
 0xb43   :  { %v1207_v10 = vmul.f32 %v1873_v40, %v1205_v0 }
 0xb45   :  { %1209 = vrot.lane.b32.xlu0 %v1207_v10, %s1884_s27 }
 0xbb7   :  { %v1210_v41 = vpop.permute.xlu0 %1209 }
 0xbb8   :  { %v1212_v11 = vadd.f32 %v1210_v41, %v1117_v63 }
 0xbba   :  { %1874 = vtanh.f32 %v1212_v11 }
 0xbc7   :  { %v1875_v12 = vpop.eup %1874 }
 0xbc8   :  { %1216 = vrot.lane.b32.xlu1 %v1875_v12, %s1885_s4 }
 0xbcc   :  { %1224 = vrot.lane.b32.xlu1 %v1222_v14, %s1885_s4 }
 0xc3a   :  { %v1217_v18 = vpop.permute.xlu1 %1216 }
 0xc3b   :  { %v1219_v21 = vmul.f32 %v1217_v18, %v1214_v15 }
 0xc3d   :  { %v2278_v22 = vadd.f32 %v1220_v20, %v1219_v21 }
 0xc3e   :  { %v1225_v23 = vpop.permute.xlu1 %1224 }
 0xc3f   :  { %1299 = vrot.lane.b32.xlu0 %v2278_v22, %s1885_s4  ;;  %1797 = vmatmul.mubr.msk.f32.vlgmr.msra.gmra.mxu0 %vm410_vm3, %v1225_v23  ;;  %v1399_v55 = vadd.f32 %v2278_v22, %v2241_v13 }
 0xc40   :  { %1811 = vmatpush3.msra.mxu0 %v2037_v35  ;;  %1818 = vmatprep.mubr.msk.f32.mxu0 %vm410_vm3, %v2089_v51 }
 0xc41   :  { %1812 = vmatprep.subr.mxu0 %v2026_v34 }
 0xc42   :  { %1813 = vmatpush3.msra.mxu0 %v2026_v34 }
 0xc43   :  { %1814 = vmatprep.subr.mxu0 %v2021_v33 }
 0xc44   :  { %1815 = vmatpush3.msra.mxu0 %v2021_v33 }
 0xc45   :  { %1816 = vmatprep.subr.mxu0 %v2016_v32 }
 0xc46   :  { %1817 = vmatpush3.msra.mxu0 %v2016_v32  ;;  %v1404_v32 = vrot.slane %v1955_v2, %v2124_v60 }
 0xc47   :  { %1819 = vmatmul.mubr.msk.f32.vlgmr.msra.gmra.mxu0 %vm410_vm3, %v2138_v17 }
 0xc48   :  { %1821 = vmatprep.mubr.msk.f32.mxu0 %vm410_vm3, %v2204_v8 }
 0xc4b   :  { %1822 = vmatmul.mubr.msk.f32.gmra.mxu0 %vm410_vm3, %v2190_v7 }
 0xc4c   :  { %1824 = vmatprep.mubr.msk.f32.mxu0 %vm410_vm3, %v2247_v3 }
 0xc4f   :  { %1825 = vmatmul.mubr.msk.f32.gmra.mxu0 %vm410_vm3, %v1225_v23 }
 0xcb1   :  { %v1300_v34 = vpop.permute.xlu0 %1299 }
 0xcb2   :  { %1808 = vmatmul.mubr.msk.f32.vlgmr.msra.gmra.mxu1 %vm410_vm3, %v1300_v34 }
 0xcff   :  { %v1294_v33 = vpop.f32.mrf.mxu0 }
 0xd00   :  { %v1295_v36 = vadd.f32 %v1294_v33, %v2166_v19 }
 0xd01   :  { %v1798_v35 = vpop.f32.mrf.mxu0 }
 0xd07   :  { %v1820_v51 = vpop.f32.mrf.mxu0 }
 0xd08   :  { %v1488_v17 = vadd.f32 %v1820_v51, %v1404_v32 }
 0xd09   :  { %v1482_v6 = vpop.f32.mrf.mxu0 }
 0xd0a   :  { %1522 = vst.msk [vmem:[%s2360_s11 + $0x8] sm:$0xff] %vm57_vm1, %v1488_v17  ;;  %v1483_v7 = vadd.f32 %v1482_v6, %v1404_v32 }
 0xd0b   :  { %v1823_v8 = vpop.f32.mrf.mxu0 }
 0xd0c   :  { %1521 = vst.msk [vmem:[%s2360_s11] sm:$0xff] %vm57_vm1, %v1483_v7  ;;  %v1498_v24 = vadd.f32 %v1823_v8, %v1404_v32 }
 0xd0d   :  { %v1492_v25 = vpop.f32.mrf.mxu0 }
 0xd0e   :  { %1524 = vst.msk [vmem:[%s2360_s11 + $0x18] sm:$0xff] %vm57_vm1, %v1498_v24  ;;  %v1493_v2 = vadd.f32 %v1492_v25, %v1404_v32 }
 0xd0f   :  { %v1826_v60 = vpop.f32.mrf.mxu0 }
 0xd10   :  { %1523 = vst.msk [vmem:[%s2360_s11 + $0x10] sm:$0xff] %vm57_vm1, %v1493_v2  ;;  %v1508_v26 = vadd.f32 %v1826_v60, %v1404_v32 }
 0xd11   :  { %v1502_v27 = vpop.f32.mrf.mxu0 }
 0xd12   :  { %1526 = vst.msk [vmem:[%s2360_s11 + $0x28] sm:$0xff] %vm57_vm1, %v1508_v26  ;;  %v1503_v28 = vadd.f32 %v1502_v27, %v1404_v32 }
 0xd14   :  { %1525 = vst.msk [vmem:[%s2360_s11 + $0x20] sm:$0xff] %vm57_vm1, %v1503_v28 }
 0xd72   :  { %v1369_v29 = vpop.f32.mrf.mxu1 }
 0xd73   :  { %v1370_v30 = vadd.f32 %v2118_v52, %v1369_v29 }
 0xd74   :  { %v1809_v31 = vpop.f32.mrf.mxu1 }
 0xd75   :  { %1381 = vrot.lane.b32.xlu0 %v1370_v30, %s1884_s27  ;;  %v1373_v37 = vadd.f32 %v1370_v30, %v1295_v36 }
 0xd77   :  { %v1570_v42 = vmul.f32 -1.442695, %v1373_v37 }
 0xd79   :  { %1876 = vpow2.f32 %v1570_v42 }
 0xd86   :  { %v1877_v47 = vpop.eup %1876 }
 0xd87   :  { %v1377_v48 = vadd.f32 1.0, %v1877_v47 }
 0xd89   :  { %1878 = vrcp.f32 %v1377_v48 }
 0xd96   :  { %v1879_v49 = vpop.eup %1878 }
 0xd97   :  { %v1391_v58 = vsub.f32 1.0, %v1879_v49  ;;  %v1397_v54 = vmul.f32 %v1879_v49, %v2278_v22 }
 0xde7   :  { %v1382_v50 = vpop.permute.xlu0 %1381 }
 0xde8   :  { %v1384_v53 = vmul.f32 %v1879_v49, %v1382_v50 }
 0xdea   :  { %1386 = vrot.lane.b32.xlu1 %v1384_v53, %s1884_s27 }
 0xdee   :  { %1408 = vrot.lane.b32.xlu1 %v1399_v55, %s1885_s4 }
 0xe5c   :  { %v1387_v52 = vpop.permute.xlu1 %1386 }
 0xe5d   :  { %v1389_v56 = vadd.f32 %v1387_v52, %v1295_v36 }
 0xe5f   :  { %1880 = vtanh.f32 %v1389_v56 }
 0xe60   :  { %v1409_v19 = vpop.permute.xlu1 %1408 }
 0xe61   :  { %1827 = vmatprep.mubr.msk.f32.mxu0 %vm410_vm3, %v1409_v19 }
 0xe6c   :  { %v1881_v57 = vpop.eup %1880 }
 0xe6d   :  { %1393 = vrot.lane.b32.xlu0 %v1881_v57, %s1885_s4 }
 0xedf   :  { %v1394_v59 = vpop.permute.xlu0 %1393 }
 0xee0   :  { %v1396_v61 = vmul.f32 %v1394_v59, %v1391_v58 }
 0xee2   :  { %v1398_v62 = vadd.f32 %v1397_v54, %v1396_v61 }
 0xee4   :  { %v1400_v1 = vadd.f32 %v1398_v62, %v2278_v22 }
 0xee6   :  { %1410 = vrot.lane.b32.xlu0 %v1400_v1, %s1885_s4 }
 0xf58   :  { %v1411_v13 = vpop.permute.xlu0 %1410 }
 0xf59   :  { %1828 = vmatmul.mubr.msk.f32.gmra.mxu0 %vm410_vm3, %v1411_v13 }
0x1019   :  { %v1829_v3 = vpop.f32.mrf.mxu0 }
0x101a   :  { %v1518_v16 = vadd.f32 %v1829_v3, %v1404_v32 }
0x101b   :  { %v1512_v43 = vpop.f32.mrf.mxu0 }
0x101c   :  { %1528 = vst.msk [vmem:[%s2360_s11 + $0x38] sm:$0xff] %vm57_vm1, %v1518_v16  ;;  %v1513_v44 = vadd.f32 %v1512_v43, %v1404_v32 }
0x101e   :  { %1527 = vst.msk [vmem:[%s2360_s11 + $0x30] sm:$0xff] %vm57_vm1, %v1513_v44 }

</bundles_post_ra>
